<compile_context>
chip_gen: v7x
topology: tpu7x:2x2x1
jax: 0.10.0
libtpu: 0.0.40
codegen_flags: <defaults>
</compile_context>

<pallas_src>
import math

import jax
import jax.numpy as jnp
from jax.experimental import pallas as pl
from jax.experimental.pallas import tpu as pltpu

DIM = 128


# ----------------------------------------------------------------------------
# Kernel
# ----------------------------------------------------------------------------
def prior_kernel(s_ref, a_ref, wA_ref, wB_ref, bA_ref, bB_ref, out_ref):
    f32 = jnp.float32
    bf16 = jnp.bfloat16

    s_prev = s_ref[...]
    a = a_ref[...]
    S = s_prev.shape[1]            # s_dim  (static)
    A = a.shape[1]                 # a_dim  (static)

    def mm(x, w):
        # bf16 MXU operands, f32 accumulation.
        return jnp.dot(x.astype(bf16), w, preferred_element_type=f32)

    relu = lambda x: jnp.maximum(x, 0.0)

    # Row offsets into the packed "A" weights (all out_features == DIM):
    #   [w11 (S+A) | w21 (S+DIM) | w31 (S+DIM) | w41 (S+DIM) | ws1 (4*DIM)]
    o11 = 0
    o21 = o11 + S + A
    o31 = o21 + S + DIM
    o41 = o31 + S + DIM
    os1 = o41 + S + DIM

    # Biases (f32), row-broadcast at the use sites.
    b11 = bA_ref[0:1, :]; b21 = bA_ref[1:2, :]; b31 = bA_ref[2:3, :]
    b41 = bA_ref[3:4, :]; bs1 = bA_ref[4:5, :]
    b12 = bB_ref[0:1, :]; b22 = bB_ref[1:2, :]; b32 = bB_ref[2:3, :]
    b42 = bB_ref[3:4, :]; bs2 = bB_ref[4:5, :]

    # h = cat([s_prev, a]); h1 = relu(fc_loc11(h))      (row-split weight)
    h1 = relu(mm(s_prev, wA_ref[o11:o11 + S, :])
              + mm(a, wA_ref[o11 + S:o11 + S + A, :]) + b11)
    h1b = h1.astype(bf16)
    # s1 = fc_loc12(h1)
    s1 = mm(h1b, wB_ref[0 * DIM:1 * DIM, :]) + b12

    # h = cat([s1, h1]); h2 = relu(fc_loc21(h)); s2 = s1 + fc_loc22(h2)
    h2 = relu(mm(s1, wA_ref[o21:o21 + S, :])
              + mm(h1b, wA_ref[o21 + S:o21 + S + DIM, :]) + b21)
    h2b = h2.astype(bf16)
    s2 = s1 + mm(h2b, wB_ref[1 * DIM:2 * DIM, :]) + b22

    # h = cat([s2, h2]); h3 = relu(fc_loc31(h)); s3 = s2 + fc_loc32(h3)
    h3 = relu(mm(s2, wA_ref[o31:o31 + S, :])
              + mm(h2b, wA_ref[o31 + S:o31 + S + DIM, :]) + b31)
    h3b = h3.astype(bf16)
    s3 = s2 + mm(h3b, wB_ref[2 * DIM:3 * DIM, :]) + b32

    # h = cat([s3, h3]); h4 = relu(fc_loc41(h)); s4 = s3 + fc_loc42(h4)
    h4 = relu(mm(s3, wA_ref[o41:o41 + S, :])
              + mm(h3b, wA_ref[o41 + S:o41 + S + DIM, :]) + b41)
    h4b = h4.astype(bf16)
    s4 = s3 + mm(h4b, wB_ref[3 * DIM:4 * DIM, :]) + b42

    # scale = fc_scale12(relu(fc_scale11(cat([h1, h2, h3, h4]))))
    z = relu(mm(h1b, wA_ref[os1 + 0 * DIM:os1 + 1 * DIM, :])
             + mm(h2b, wA_ref[os1 + 1 * DIM:os1 + 2 * DIM, :])
             + mm(h3b, wA_ref[os1 + 2 * DIM:os1 + 3 * DIM, :])
             + mm(h4b, wA_ref[os1 + 3 * DIM:os1 + 4 * DIM, :])
             + bs1)
    scale = mm(z, wB_ref[4 * DIM:5 * DIM, :]) + bs2

    # softplus(x) = max(x, 0) + log(1 + exp(-|x|))   (numerically stable, f32)
    scale_sp = jnp.maximum(scale, 0.0) + jnp.log(1.0 + jnp.exp(-jnp.abs(scale)))

    # Single fused output [loc | softplus(scale)] -> one output DMA.
    out_ref[:, 0:S] = s4
    out_ref[:, S:2 * S] = scale_sp


# ----------------------------------------------------------------------------
# Parameter init (deterministic; mirrors nn.Linear default U(-1/sqrt(fan_in)))
# ----------------------------------------------------------------------------
def _linear(key, fan_in, fan_out):
    kw, kb = jax.random.split(key)
    bound = 1.0 / math.sqrt(fan_in)
    w = jax.random.uniform(kw, (fan_in, fan_out), jnp.float32, -bound, bound)
    b = jax.random.uniform(kb, (1, fan_out), jnp.float32, -bound, bound)
    return w, b


def init_prior_params(key, s_dim, a_dim):
    keys = jax.random.split(key, 10)
    params = []
    params += _linear(keys[0], s_dim + a_dim, DIM)   # fc_loc11
    params += _linear(keys[1], DIM, s_dim)           # fc_loc12
    params += _linear(keys[2], s_dim + DIM, DIM)     # fc_loc21
    params += _linear(keys[3], DIM, s_dim)           # fc_loc22
    params += _linear(keys[4], s_dim + DIM, DIM)     # fc_loc31
    params += _linear(keys[5], DIM, s_dim)           # fc_loc32
    params += _linear(keys[6], s_dim + DIM, DIM)     # fc_loc41
    params += _linear(keys[7], DIM, s_dim)           # fc_loc42
    params += _linear(keys[8], DIM * 4, DIM)         # fc_scale11
    params += _linear(keys[9], DIM, s_dim)           # fc_scale12
    return tuple(params)


def pack_prior_params(params, weight_dtype=jnp.bfloat16):
    """Pack 10 weights -> 2 arrays, 10 biases -> 2 arrays (fewer input DMAs)."""
    (w11, b11, w12, b12, w21, b21, w22, b22, w31, b31, w32, b32,
     w41, b41, w42, b42, ws1, bs1, ws2, bs2) = params
    s_dim = w12.shape[1]
    a_dim = w11.shape[0] - s_dim
    # The static row slices inside the kernel are only free/valid on sublane
    # tile boundaries (f32 tile = 8 rows, bf16 tile = 16 rows) -> guard.
    align = 16 if weight_dtype == jnp.bfloat16 else 8
    assert s_dim % align == 0 and a_dim % align == 0, (
        "pad s_dim / a_dim to a multiple of the sublane tile")
    wA = jnp.concatenate([w11, w21, w31, w41, ws1], 0).astype(weight_dtype)
    wB = jnp.concatenate([w12, w22, w32, w42, ws2], 0).astype(weight_dtype)
    bA = jnp.concatenate([b11, b21, b31, b41, bs1], 0)   # (5, DIM)   f32
    bB = jnp.concatenate([b12, b22, b32, b42, bs2], 0)   # (5, s_dim) f32
    return wA, wB, bA, bB


# ----------------------------------------------------------------------------
# Wrapper
# ----------------------------------------------------------------------------
@jax.jit
def prior_forward(packed, s_prev, a):
    B, S = s_prev.shape
    vmem = pl.BlockSpec(memory_space=pltpu.MemorySpace.VMEM)
    out = pl.pallas_call(
        prior_kernel,
        out_shape=jax.ShapeDtypeStruct((B, 2 * S), jnp.float32),
        in_specs=[vmem] * 6,
        out_specs=vmem,
    )(s_prev, a, *packed)
    return out[:, :S], out[:, S:]


# Pure-JAX f32 reference (mirrors the PyTorch forward 1:1, with concatenations).
def prior_forward_ref(params, s_prev, a):
    (w11, b11, w12, b12, w21, b21, w22, b22, w31, b31, w32, b32,
     w41, b41, w42, b42, ws1, bs1, ws2, bs2) = params
    relu = lambda x: jnp.maximum(x, 0.0)
    h1 = relu(jnp.concatenate([s_prev, a], 1) @ w11 + b11)
    s1 = h1 @ w12 + b12
    h2 = relu(jnp.concatenate([s1, h1], 1) @ w21 + b21)
    s2 = s1 + h2 @ w22 + b22
    h3 = relu(jnp.concatenate([s2, h2], 1) @ w31 + b31)
    s3 = s2 + h3 @ w32 + b32
    h4 = relu(jnp.concatenate([s3, h3], 1) @ w41 + b41)
    s4 = s3 + h4 @ w42 + b42
    scale = relu(jnp.concatenate([h1, h2, h3, h4], 1) @ ws1 + bs1) @ ws2 + bs2
    return s4, jax.nn.softplus(scale)


if __name__ == "__main__":
    S_DIM, A_DIM, BATCH = 32, 16, 8

    key = jax.random.PRNGKey(0)
    kp, ks, ka = jax.random.split(key, 3)
    params = init_prior_params(kp, S_DIM, A_DIM)
    packed = pack_prior_params(params)                  # bf16 weights, f32 biases
    s_prev = jax.random.normal(ks, (BATCH, S_DIM), jnp.float32)
    a = jax.random.normal(ka, (BATCH, A_DIM), jnp.float32)

    loc, scale = jax.block_until_ready(prior_forward(packed, s_prev, a))

    loc_ref, scale_ref = prior_forward_ref(params, s_prev, a)
    assert loc.shape == (BATCH, S_DIM) and scale.shape == (BATCH, S_DIM)
    # bf16 MXU operands -> loosened tolerance vs. the f32 reference.
    assert jnp.allclose(loc, loc_ref, atol=3e-2, rtol=3e-2), \
        float(jnp.max(jnp.abs(loc - loc_ref)))
    assert jnp.allclose(scale, scale_ref, atol=3e-2, rtol=3e-2), \
        float(jnp.max(jnp.abs(scale - scale_ref)))

    print("KERNEL_OK")
</pallas_src>

<mosaic_0001>
module attributes {stable_mosaic.version = 11 : i64} {
  func.func @prior_kernel(%arg0: memref<8x32xf32, #tpu.memory_space<vmem>>, %arg1: memref<8x16xf32, #tpu.memory_space<vmem>>, %arg2: memref<1040x128xbf16, #tpu.memory_space<vmem>>, %arg3: memref<640x32xbf16, #tpu.memory_space<vmem>>, %arg4: memref<5x128xf32, #tpu.memory_space<vmem>>, %arg5: memref<5x32xf32, #tpu.memory_space<vmem>>, %arg6: memref<8x64xf32, #tpu.memory_space<vmem>>) attributes {dimension_semantics = [], scalar_prefetch = 0 : i64, scratch_operands = 0 : i64, tpu.core_type = #tpu.core_type<tc>} {
    %c0 = arith.constant 0 : index
    %c0_0 = arith.constant 0 : index
    %0 = vector.load %arg0[%c0, %c0_0] : memref<8x32xf32, #tpu.memory_space<vmem>>, vector<8x32xf32>
    %c0_1 = arith.constant 0 : index
    %c0_2 = arith.constant 0 : index
    %1 = vector.load %arg1[%c0_1, %c0_2] : memref<8x16xf32, #tpu.memory_space<vmem>>, vector<8x16xf32>
    %c0_3 = arith.constant 0 : index
    %c0_4 = arith.constant 0 : index
    %2 = vector.load %arg4[%c0_3, %c0_4] : memref<5x128xf32, #tpu.memory_space<vmem>>, vector<1x128xf32>
    %c1 = arith.constant 1 : index
    %c0_5 = arith.constant 0 : index
    %3 = vector.load %arg4[%c1, %c0_5] : memref<5x128xf32, #tpu.memory_space<vmem>>, vector<1x128xf32>
    %c2 = arith.constant 2 : index
    %c0_6 = arith.constant 0 : index
    %4 = vector.load %arg4[%c2, %c0_6] : memref<5x128xf32, #tpu.memory_space<vmem>>, vector<1x128xf32>
    %c3 = arith.constant 3 : index
    %c0_7 = arith.constant 0 : index
    %5 = vector.load %arg4[%c3, %c0_7] : memref<5x128xf32, #tpu.memory_space<vmem>>, vector<1x128xf32>
    %c4 = arith.constant 4 : index
    %c0_8 = arith.constant 0 : index
    %6 = vector.load %arg4[%c4, %c0_8] : memref<5x128xf32, #tpu.memory_space<vmem>>, vector<1x128xf32>
    %c0_9 = arith.constant 0 : index
    %c0_10 = arith.constant 0 : index
    %7 = vector.load %arg5[%c0_9, %c0_10] : memref<5x32xf32, #tpu.memory_space<vmem>>, vector<1x32xf32>
    %c1_11 = arith.constant 1 : index
    %c0_12 = arith.constant 0 : index
    %8 = vector.load %arg5[%c1_11, %c0_12] : memref<5x32xf32, #tpu.memory_space<vmem>>, vector<1x32xf32>
    %c2_13 = arith.constant 2 : index
    %c0_14 = arith.constant 0 : index
    %9 = vector.load %arg5[%c2_13, %c0_14] : memref<5x32xf32, #tpu.memory_space<vmem>>, vector<1x32xf32>
    %c3_15 = arith.constant 3 : index
    %c0_16 = arith.constant 0 : index
    %10 = vector.load %arg5[%c3_15, %c0_16] : memref<5x32xf32, #tpu.memory_space<vmem>>, vector<1x32xf32>
    %c4_17 = arith.constant 4 : index
    %c0_18 = arith.constant 0 : index
    %11 = vector.load %arg5[%c4_17, %c0_18] : memref<5x32xf32, #tpu.memory_space<vmem>>, vector<1x32xf32>
    %c0_19 = arith.constant 0 : index
    %c0_20 = arith.constant 0 : index
    %12 = vector.load %arg2[%c0_19, %c0_20] : memref<1040x128xbf16, #tpu.memory_space<vmem>>, vector<32x128xbf16>
    %13 = arith.truncf %0 : vector<8x32xf32> to vector<8x32xbf16>
    %cst = arith.constant dense<0.000000e+00> : vector<8x128xf32>
    %14 = tpu.matmul %13, %12, %cst {dimension_numbers = #tpu.dot_dimension_numbers<[1], [0], [0], [1], [0, 0, 1, 1], [], []>} : vector<8x32xbf16>, vector<32x128xbf16>, vector<8x128xf32> -> vector<8x128xf32>
    %c32 = arith.constant 32 : index
    %c0_21 = arith.constant 0 : index
    %15 = vector.load %arg2[%c32, %c0_21] : memref<1040x128xbf16, #tpu.memory_space<vmem>>, vector<16x128xbf16>
    %16 = arith.truncf %1 : vector<8x16xf32> to vector<8x16xbf16>
    %cst_22 = arith.constant dense<0.000000e+00> : vector<8x128xf32>
    %17 = tpu.matmul %16, %15, %cst_22 {dimension_numbers = #tpu.dot_dimension_numbers<[1], [0], [0], [1], [0, 0, 1, 1], [], []>} : vector<8x16xbf16>, vector<16x128xbf16>, vector<8x128xf32> -> vector<8x128xf32>
    %18 = arith.addf %14, %17 : vector<8x128xf32>
    %19 = vector.broadcast %2 : vector<1x128xf32> to vector<8x128xf32>
    %20 = arith.addf %18, %19 : vector<8x128xf32>
    %cst_23 = arith.constant 0.000000e+00 : f32
    %21 = vector.broadcast %cst_23 : f32 to vector<8x128xf32>
    %22 = arith.maximumf %20, %21 : vector<8x128xf32>
    %23 = arith.truncf %22 : vector<8x128xf32> to vector<8x128xbf16>
    %c0_24 = arith.constant 0 : index
    %c0_25 = arith.constant 0 : index
    %24 = vector.load %arg3[%c0_24, %c0_25] : memref<640x32xbf16, #tpu.memory_space<vmem>>, vector<128x32xbf16>
    %cst_26 = arith.constant dense<0.000000e+00> : vector<8x32xf32>
    %25 = tpu.matmul %23, %24, %cst_26 {dimension_numbers = #tpu.dot_dimension_numbers<[1], [0], [0], [1], [0, 0, 1, 1], [], []>} : vector<8x128xbf16>, vector<128x32xbf16>, vector<8x32xf32> -> vector<8x32xf32>
    %26 = vector.broadcast %7 : vector<1x32xf32> to vector<8x32xf32>
    %27 = arith.addf %25, %26 : vector<8x32xf32>
    %c48 = arith.constant 48 : index
    %c0_27 = arith.constant 0 : index
    %28 = vector.load %arg2[%c48, %c0_27] : memref<1040x128xbf16, #tpu.memory_space<vmem>>, vector<32x128xbf16>
    %29 = arith.truncf %27 : vector<8x32xf32> to vector<8x32xbf16>
    %cst_28 = arith.constant dense<0.000000e+00> : vector<8x128xf32>
    %30 = tpu.matmul %29, %28, %cst_28 {dimension_numbers = #tpu.dot_dimension_numbers<[1], [0], [0], [1], [0, 0, 1, 1], [], []>} : vector<8x32xbf16>, vector<32x128xbf16>, vector<8x128xf32> -> vector<8x128xf32>
    %c80 = arith.constant 80 : index
    %c0_29 = arith.constant 0 : index
    %31 = vector.load %arg2[%c80, %c0_29] : memref<1040x128xbf16, #tpu.memory_space<vmem>>, vector<128x128xbf16>
    %cst_30 = arith.constant dense<0.000000e+00> : vector<8x128xf32>
    %32 = tpu.matmul %23, %31, %cst_30 {dimension_numbers = #tpu.dot_dimension_numbers<[1], [0], [0], [1], [0, 0, 1, 1], [], []>} : vector<8x128xbf16>, vector<128x128xbf16>, vector<8x128xf32> -> vector<8x128xf32>
    %33 = arith.addf %30, %32 : vector<8x128xf32>
    %34 = vector.broadcast %3 : vector<1x128xf32> to vector<8x128xf32>
    %35 = arith.addf %33, %34 : vector<8x128xf32>
    %cst_31 = arith.constant 0.000000e+00 : f32
    %36 = vector.broadcast %cst_31 : f32 to vector<8x128xf32>
    %37 = arith.maximumf %35, %36 : vector<8x128xf32>
    %38 = arith.truncf %37 : vector<8x128xf32> to vector<8x128xbf16>
    %c128 = arith.constant 128 : index
    %c0_32 = arith.constant 0 : index
    %39 = vector.load %arg3[%c128, %c0_32] : memref<640x32xbf16, #tpu.memory_space<vmem>>, vector<128x32xbf16>
    %cst_33 = arith.constant dense<0.000000e+00> : vector<8x32xf32>
    %40 = tpu.matmul %38, %39, %cst_33 {dimension_numbers = #tpu.dot_dimension_numbers<[1], [0], [0], [1], [0, 0, 1, 1], [], []>} : vector<8x128xbf16>, vector<128x32xbf16>, vector<8x32xf32> -> vector<8x32xf32>
    %41 = arith.addf %27, %40 : vector<8x32xf32>
    %42 = vector.broadcast %8 : vector<1x32xf32> to vector<8x32xf32>
    %43 = arith.addf %41, %42 : vector<8x32xf32>
    %c208 = arith.constant 208 : index
    %c0_34 = arith.constant 0 : index
    %44 = vector.load %arg2[%c208, %c0_34] : memref<1040x128xbf16, #tpu.memory_space<vmem>>, vector<32x128xbf16>
    %45 = arith.truncf %43 : vector<8x32xf32> to vector<8x32xbf16>
    %cst_35 = arith.constant dense<0.000000e+00> : vector<8x128xf32>
    %46 = tpu.matmul %45, %44, %cst_35 {dimension_numbers = #tpu.dot_dimension_numbers<[1], [0], [0], [1], [0, 0, 1, 1], [], []>} : vector<8x32xbf16>, vector<32x128xbf16>, vector<8x128xf32> -> vector<8x128xf32>
    %c240 = arith.constant 240 : index
    %c0_36 = arith.constant 0 : index
    %47 = vector.load %arg2[%c240, %c0_36] : memref<1040x128xbf16, #tpu.memory_space<vmem>>, vector<128x128xbf16>
    %cst_37 = arith.constant dense<0.000000e+00> : vector<8x128xf32>
    %48 = tpu.matmul %38, %47, %cst_37 {dimension_numbers = #tpu.dot_dimension_numbers<[1], [0], [0], [1], [0, 0, 1, 1], [], []>} : vector<8x128xbf16>, vector<128x128xbf16>, vector<8x128xf32> -> vector<8x128xf32>
    %49 = arith.addf %46, %48 : vector<8x128xf32>
    %50 = vector.broadcast %4 : vector<1x128xf32> to vector<8x128xf32>
    %51 = arith.addf %49, %50 : vector<8x128xf32>
    %cst_38 = arith.constant 0.000000e+00 : f32
    %52 = vector.broadcast %cst_38 : f32 to vector<8x128xf32>
    %53 = arith.maximumf %51, %52 : vector<8x128xf32>
    %54 = arith.truncf %53 : vector<8x128xf32> to vector<8x128xbf16>
    %c256 = arith.constant 256 : index
    %c0_39 = arith.constant 0 : index
    %55 = vector.load %arg3[%c256, %c0_39] : memref<640x32xbf16, #tpu.memory_space<vmem>>, vector<128x32xbf16>
    %cst_40 = arith.constant dense<0.000000e+00> : vector<8x32xf32>
    %56 = tpu.matmul %54, %55, %cst_40 {dimension_numbers = #tpu.dot_dimension_numbers<[1], [0], [0], [1], [0, 0, 1, 1], [], []>} : vector<8x128xbf16>, vector<128x32xbf16>, vector<8x32xf32> -> vector<8x32xf32>
    %57 = arith.addf %43, %56 : vector<8x32xf32>
    %58 = vector.broadcast %9 : vector<1x32xf32> to vector<8x32xf32>
    %59 = arith.addf %57, %58 : vector<8x32xf32>
    %c368 = arith.constant 368 : index
    %c0_41 = arith.constant 0 : index
    %60 = vector.load %arg2[%c368, %c0_41] : memref<1040x128xbf16, #tpu.memory_space<vmem>>, vector<32x128xbf16>
    %61 = arith.truncf %59 : vector<8x32xf32> to vector<8x32xbf16>
    %cst_42 = arith.constant dense<0.000000e+00> : vector<8x128xf32>
    %62 = tpu.matmul %61, %60, %cst_42 {dimension_numbers = #tpu.dot_dimension_numbers<[1], [0], [0], [1], [0, 0, 1, 1], [], []>} : vector<8x32xbf16>, vector<32x128xbf16>, vector<8x128xf32> -> vector<8x128xf32>
    %c400 = arith.constant 400 : index
    %c0_43 = arith.constant 0 : index
    %63 = vector.load %arg2[%c400, %c0_43] : memref<1040x128xbf16, #tpu.memory_space<vmem>>, vector<128x128xbf16>
    %cst_44 = arith.constant dense<0.000000e+00> : vector<8x128xf32>
    %64 = tpu.matmul %54, %63, %cst_44 {dimension_numbers = #tpu.dot_dimension_numbers<[1], [0], [0], [1], [0, 0, 1, 1], [], []>} : vector<8x128xbf16>, vector<128x128xbf16>, vector<8x128xf32> -> vector<8x128xf32>
    %65 = arith.addf %62, %64 : vector<8x128xf32>
    %66 = vector.broadcast %5 : vector<1x128xf32> to vector<8x128xf32>
    %67 = arith.addf %65, %66 : vector<8x128xf32>
    %cst_45 = arith.constant 0.000000e+00 : f32
    %68 = vector.broadcast %cst_45 : f32 to vector<8x128xf32>
    %69 = arith.maximumf %67, %68 : vector<8x128xf32>
    %70 = arith.truncf %69 : vector<8x128xf32> to vector<8x128xbf16>
    %c384 = arith.constant 384 : index
    %c0_46 = arith.constant 0 : index
    %71 = vector.load %arg3[%c384, %c0_46] : memref<640x32xbf16, #tpu.memory_space<vmem>>, vector<128x32xbf16>
    %cst_47 = arith.constant dense<0.000000e+00> : vector<8x32xf32>
    %72 = tpu.matmul %70, %71, %cst_47 {dimension_numbers = #tpu.dot_dimension_numbers<[1], [0], [0], [1], [0, 0, 1, 1], [], []>} : vector<8x128xbf16>, vector<128x32xbf16>, vector<8x32xf32> -> vector<8x32xf32>
    %73 = arith.addf %59, %72 : vector<8x32xf32>
    %74 = vector.broadcast %10 : vector<1x32xf32> to vector<8x32xf32>
    %75 = arith.addf %73, %74 : vector<8x32xf32>
    %c528 = arith.constant 528 : index
    %c0_48 = arith.constant 0 : index
    %76 = vector.load %arg2[%c528, %c0_48] : memref<1040x128xbf16, #tpu.memory_space<vmem>>, vector<128x128xbf16>
    %cst_49 = arith.constant dense<0.000000e+00> : vector<8x128xf32>
    %77 = tpu.matmul %23, %76, %cst_49 {dimension_numbers = #tpu.dot_dimension_numbers<[1], [0], [0], [1], [0, 0, 1, 1], [], []>} : vector<8x128xbf16>, vector<128x128xbf16>, vector<8x128xf32> -> vector<8x128xf32>
    %c656 = arith.constant 656 : index
    %c0_50 = arith.constant 0 : index
    %78 = vector.load %arg2[%c656, %c0_50] : memref<1040x128xbf16, #tpu.memory_space<vmem>>, vector<128x128xbf16>
    %cst_51 = arith.constant dense<0.000000e+00> : vector<8x128xf32>
    %79 = tpu.matmul %38, %78, %cst_51 {dimension_numbers = #tpu.dot_dimension_numbers<[1], [0], [0], [1], [0, 0, 1, 1], [], []>} : vector<8x128xbf16>, vector<128x128xbf16>, vector<8x128xf32> -> vector<8x128xf32>
    %80 = arith.addf %77, %79 : vector<8x128xf32>
    %c784 = arith.constant 784 : index
    %c0_52 = arith.constant 0 : index
    %81 = vector.load %arg2[%c784, %c0_52] : memref<1040x128xbf16, #tpu.memory_space<vmem>>, vector<128x128xbf16>
    %cst_53 = arith.constant dense<0.000000e+00> : vector<8x128xf32>
    %82 = tpu.matmul %54, %81, %cst_53 {dimension_numbers = #tpu.dot_dimension_numbers<[1], [0], [0], [1], [0, 0, 1, 1], [], []>} : vector<8x128xbf16>, vector<128x128xbf16>, vector<8x128xf32> -> vector<8x128xf32>
    %83 = arith.addf %80, %82 : vector<8x128xf32>
    %c912 = arith.constant 912 : index
    %c0_54 = arith.constant 0 : index
    %84 = vector.load %arg2[%c912, %c0_54] : memref<1040x128xbf16, #tpu.memory_space<vmem>>, vector<128x128xbf16>
    %cst_55 = arith.constant dense<0.000000e+00> : vector<8x128xf32>
    %85 = tpu.matmul %70, %84, %cst_55 {dimension_numbers = #tpu.dot_dimension_numbers<[1], [0], [0], [1], [0, 0, 1, 1], [], []>} : vector<8x128xbf16>, vector<128x128xbf16>, vector<8x128xf32> -> vector<8x128xf32>
    %86 = arith.addf %83, %85 : vector<8x128xf32>
    %87 = vector.broadcast %6 : vector<1x128xf32> to vector<8x128xf32>
    %88 = arith.addf %86, %87 : vector<8x128xf32>
    %cst_56 = arith.constant 0.000000e+00 : f32
    %89 = vector.broadcast %cst_56 : f32 to vector<8x128xf32>
    %90 = arith.maximumf %88, %89 : vector<8x128xf32>
    %c512 = arith.constant 512 : index
    %c0_57 = arith.constant 0 : index
    %91 = vector.load %arg3[%c512, %c0_57] : memref<640x32xbf16, #tpu.memory_space<vmem>>, vector<128x32xbf16>
    %92 = arith.truncf %90 : vector<8x128xf32> to vector<8x128xbf16>
    %cst_58 = arith.constant dense<0.000000e+00> : vector<8x32xf32>
    %93 = tpu.matmul %92, %91, %cst_58 {dimension_numbers = #tpu.dot_dimension_numbers<[1], [0], [0], [1], [0, 0, 1, 1], [], []>} : vector<8x128xbf16>, vector<128x32xbf16>, vector<8x32xf32> -> vector<8x32xf32>
    %94 = vector.broadcast %11 : vector<1x32xf32> to vector<8x32xf32>
    %95 = arith.addf %93, %94 : vector<8x32xf32>
    %cst_59 = arith.constant 0.000000e+00 : f32
    %96 = vector.broadcast %cst_59 : f32 to vector<8x32xf32>
    %97 = arith.maximumf %95, %96 : vector<8x32xf32>
    %98 = math.absf %95 : vector<8x32xf32>
    %cst_60 = arith.constant 0.000000e+00 : f32
    %99 = vector.broadcast %cst_60 : f32 to vector<8x32xf32>
    %100 = arith.subf %99, %98 : vector<8x32xf32>
    %101 = math.exp %100 : vector<8x32xf32>
    %cst_61 = arith.constant 1.000000e+00 : f32
    %102 = vector.broadcast %cst_61 : f32 to vector<8x32xf32>
    %103 = arith.addf %102, %101 : vector<8x32xf32>
    %104 = math.log %103 : vector<8x32xf32>
    %105 = arith.addf %97, %104 : vector<8x32xf32>
    %c0_62 = arith.constant 0 : index
    %c0_63 = arith.constant 0 : index
    %106 = vector.load %arg6[%c0_62, %c0_63] : memref<8x64xf32, #tpu.memory_space<vmem>>, vector<8x32xf32>
    tpu.vector_store %arg6[%c0_62, %c0_63], %75 {strides = array<i32>} : memref<8x64xf32, #tpu.memory_space<vmem>>, vector<8x32xf32>,
    %c0_64 = arith.constant 0 : index
    %c32_65 = arith.constant 32 : index
    %107 = vector.load %arg6[%c0_64, %c32_65] : memref<8x64xf32, #tpu.memory_space<vmem>>, vector<8x32xf32>
    tpu.vector_store %arg6[%c0_64, %c32_65], %105 {strides = array<i32>} : memref<8x64xf32, #tpu.memory_space<vmem>>, vector<8x32xf32>,
    return
  }
}

</mosaic_0001>

<bundles_post_ra>
// kernel: prior_forward.1
= control target key start
LH: loop header
LB: loop body
LE: loop exit
PB: predicated region body
PF: predicated region fallthrough
CT: control target
= control target key end

     0   :  { %11 = vsyncpa [#allocation3], 0  ;;  %s2335_s21 = smov [#allocation2]   ;;  %s2730_s0 = inlined_call_operand.vmem [shape: f32[8,32], index: 0, kind: input, shape index: {}]   ;;  %s2731_s1 = inlined_call_operand.vmem [shape: f32[8,16], index: 1, kind: input, shape index: {}]   ;;  %s2732_s2 = inlined_call_operand.hbm [shape: bf16[1040,128], index: 2, kind: input, shape index: {}]   ;;  %s2733_s3 = inlined_call_operand.vmem [shape: bf16[640,32], index: 3, kind: input, shape index: {}]   ;;  %s2734_s4 = inlined_call_operand.vmem [shape: f32[5,128], index: 4, kind: input, shape index: {}]   ;;  %s2735_s5 = inlined_call_operand.vmem [shape: f32[5,32], index: 5, kind: input, shape index: {}]   ;;  %s2736_s6 = inlined_call_operand.vmem [shape: f32[8,64], index: 6, kind: output, shape index: {}]  }
   0x1   :  { %s21_s22 = sshll.u32 %s2335_s21, 4  ;;  %s2311_s25 = scalar_lea.hbm %s2732_s2, 8320  ;;  %s22_s22 = int_to_ptr.vmem [resolvable:$true] %s21_s22 }
   0x2   :  { %p2312_p0 = scmp.ne.s32.totalorder %s2732_s2, %s2311_s25  ;;  %p2315_p1 = scmp.lt.u32.totalorder %s2311_s25, %s2732_s2 }
   0x4   :  { %p2317_p2 = pnand %p2315_p1, %p2312_p0 }
   0x6   :  { %2320 = shalt.err (!%p2317_p2)
}
   0x7   :  { %s2321_s30 = scalar_lea.vmem %s22_s22, 8320  ;;  %p2326_p4 = scmp.lt.s32.totalorder %s22_s22, %s22_s22 }
   0x8   :  { %p2322_p3 = scmp.ne.s32.totalorder %s22_s22, %s2321_s30  ;;  %p2327_p5 = scmp.lt.s32.totalorder %s2321_s30, %s2321_s30 }
   0xa   :  { %p2328_p6 = por %p2327_p5, %p2326_p4 }
   0xc   :  { %p2329_p7 = pnand %p2328_p6, %p2322_p3 }
   0xe   :  { %2332 = shalt.err (!%p2329_p7)
}
   0xf   :  { %s2336_s7 = smov 64   ;;  %s2337_s8 = smov 4  }
  0x10   :  { %27 = dma.hbm_to_vmem [thread:$0]  %s2732_s2, 8320, %s22_s22, [#allocation3], %s2336_s7, %s2336_s7, %s2337_s8  }
  0x11   :  { %2333 = dma.done.wait [#allocation3], 8320  }
  0x12   :  { %2334 = vsyncadd [#allocation3], 4294958976  ;;  %v2338_v0 = vmov 0.0   ;;  %vm2339_vm0 = vmmov 0   ;;  %v2202_v1 = vld [vmem:[#allocation2] sm:$0xff]   ;;  %v2203_v2 = vld [vmem:[#allocation2 + $0x10] sm:$0xff]  }
  0x13   :  { %1924 = vmatprep.subr.bf16.mxu1 %v2338_v0  ;;  %1918 = vmatprep.subr.bf16.mxu0 %v2338_v0  ;;  %v39_v3 = vld [vmem:[%s2731_s1] sm:$0xff]  ;;  %vm64_vm1 = vcmask 130048   ;;  %v2204_v5 = vld [vmem:[#allocation2 + $0x8] sm:$0xff]   ;;  %vm120_vm2 = vcmask 261120   ;;  %v2208_v11 = vld [vmem:[#allocation2 + $0x30] sm:$0xff]   ;;  %vm1669_vm3 = vcmask 523520  }
  0x14   :  { %1920 = vmatprep.mubr.msk.bf16.mxu0 %vm2339_vm0, %v2338_v0  ;;  %1928 = vmatprep.mubr.msk.bf16.mxu1 %vm2339_vm0, %v2338_v0  ;;  %v57_v4 = vpack.c.bf16 %v39_v3, %v39_v3  ;;  %v38_v6 = vld [vmem:[%s2730_s0] sm:$0xff]  ;;  %v2206_v9 = vld [vmem:[#allocation2 + $0x28] sm:$0xff]   ;;  %v2209_v12 = vld [vmem:[%s2733_s3 + $0x10] sm:$0xff]  }
  0x15   :  { %1925 = vmatpush3.bf16.msra.mxu1 %v2202_v1  ;;  %1919 = vmatpush3.bf16.msra.mxu0 %v2203_v2  ;;  %v2205_v7 = vld [vmem:[%s2733_s3] sm:$0xff]   ;;  %v54_v8 = vpack.c.bf16 %v38_v6, %v38_v6  ;;  %v2207_v10 = vld [vmem:[%s2733_s3 + $0x8] sm:$0xff]   ;;  %v2210_v13 = vld [vmem:[#allocation2 + $0x38] sm:$0xff]  }
  0x16   :  { %1926 = vmatprep.subr.bf16.mxu1 %v2338_v0  ;;  %1932 = vmatprep.subr.bf16.mxu0 %v2338_v0  ;;  %v2211_v14 = vld [vmem:[%s2733_s3 + $0x18] sm:$0xff]   ;;  %v2212_v15 = vld [vmem:[#allocation2 + $0x40] sm:$0xff]   ;;  %v2214_v17 = vld [vmem:[#allocation2 + $0x48] sm:$0xff]  }
  0x17   :  { %v2213_v16 = vld [vmem:[%s2733_s3 + $0x20] sm:$0xff]   ;;  %v2215_v18 = vld [vmem:[%s2733_s3 + $0x28] sm:$0xff]   ;;  %v2216_v19 = vld [vmem:[#allocation2 + $0x50] sm:$0xff]  }
  0x18   :  { %1921 = vmatmul.mubr.msk.bf16.vlgmr.msra.gmra.mrb[0].mxu0 %vm64_vm1, %v57_v4  ;;  %v2217_v20 = vld [vmem:[%s2733_s3 + $0x30] sm:$0xff]   ;;  %v2218_v21 = vld [vmem:[#allocation2 + $0x58] sm:$0xff]   ;;  %v2220_v23 = vld [vmem:[#allocation2 + $0x60] sm:$0xff]  }
  0x19   :  { %1927 = vmatpush3.bf16.msra.mxu1 %v2204_v5  ;;  %1933 = vmatpush3.bf16.msra.mxu0 %v2205_v7  ;;  %v2219_v22 = vld [vmem:[%s2733_s3 + $0x38] sm:$0xff]   ;;  %v1681_v28 = vld [vmem:[%s2734_s4] ss:$0 sm:$0xff]  ;;  %v2225_v40 = vld [vmem:[%s2733_s3 + $0x48] sm:$0xff]  }
  0x1a   :  { %1952 = vmatprep.subr.bf16.mxu1 %v2338_v0  ;;  %1934 = vmatprep.subr.bf16.mxu0 %v2338_v0  ;;  %v2221_v36 = vld [vmem:[#allocation2 + $0x18] sm:$0xff]   ;;  %v2222_v38 = vld [vmem:[#allocation2 + $0x20] sm:$0xff]   ;;  %v2227_v41 = vld [vmem:[%s2733_s3 + $0x50] sm:$0xff]  }
  0x1b   :  { %1948 = vmatprep.mubr.msk.bf16.mxu0 %vm2339_vm0, %v2338_v0  ;;  %v2223_v39 = vld [vmem:[%s2733_s3 + $0x40] sm:$0xff]   ;;  %v2229_v42 = vld [vmem:[%s2733_s3 + $0x58] sm:$0xff]   ;;  %v2233_v44 = vld [vmem:[%s2733_s3 + $0x68] sm:$0xff]  }
  0x1c   :  { %1929 = vmatmul.mubr.msk.bf16.vlgmr.msra.gmra.mrb[0].mxu1 %vm120_vm2, %v54_v8  ;;  %v2231_v43 = vld [vmem:[%s2733_s3 + $0x60] sm:$0xff]   ;;  %v2224_v53 = vld [vmem:[#allocation2 + $0x78] sm:$0xff]   ;;  %v2228_v58 = vld [vmem:[#allocation2 + $0x88] sm:$0xff]  }
  0x1d   :  { %1953 = vmatpush3.bf16.msra.mxu1 %v2206_v9  ;;  %1968 = vmatprep.mubr.msk.bf16.mxu1 %vm2339_vm0, %v2338_v0  ;;  %v1682_v45 = vld [vmem:[%s2735_s5] ss:$0 sm:$0xff]  ;;  %v2230_v59 = vld [vmem:[#allocation2 + $0x90] sm:$0xff]   ;;  %v2232_v60 = vld [vmem:[#allocation2 + $0x98] sm:$0xff]  }
  0x1e   :  { %1954 = vmatprep.subr.bf16.mxu1 %v2338_v0  ;;  %1935 = vmatpush3.bf16.msra.mxu0 %v2207_v10  ;;  %v2226_v57 = vld [vmem:[#allocation2 + $0x80] sm:$0xff]   ;;  %v2235_v62 = vld [vmem:[%s2733_s3 + $0x70] sm:$0xff]   ;;  %v2236_v63 = vld [vmem:[#allocation2 + $0xa8] sm:$0xff]  }
  0x1f   :  { %1936 = vmatprep.subr.bf16.mxu0 %v2338_v0  ;;  %v2234_v61 = vld [vmem:[#allocation2 + $0xa0] sm:$0xff]   ;;  %v2237_v1 = vld [vmem:[%s2733_s3 + $0x78] sm:$0xff]   ;;  %v2238_v2 = vld [vmem:[#allocation2 + $0xb0] sm:$0xff]  }
  0x20   :  { %v1702_v3 = vld [vmem:[%s2734_s4 + $0x1] ss:$0 sm:$0xff] }
  0x21   :  { %1955 = vmatpush3.bf16.msra.mxu1 %v2208_v11  ;;  %v2239_v11 = vld [vmem:[#allocation2 + $0x68] sm:$0xff]  }
  0x22   :  { %1956 = vmatprep.subr.bf16.mxu1 %v2338_v0  ;;  %1937 = vmatpush3.bf16.msra.mxu0 %v2209_v12 }
  0x23   :  { %1938 = vmatprep.subr.bf16.mxu0 %v2338_v0 }
  0x25   :  { %1957 = vmatpush3.bf16.msra.mxu1 %v2210_v13  ;;  %v2240_v13 = vld [vmem:[#allocation2 + $0x70] sm:$0xff]  }
  0x26   :  { %1958 = vmatprep.subr.bf16.mxu1 %v2338_v0  ;;  %1939 = vmatpush3.bf16.msra.mxu0 %v2211_v14  ;;  %v2241_v14 = vld [vmem:[%s2733_s3 + $0x80] sm:$0xff]  }
  0x27   :  { %1940 = vmatprep.subr.bf16.mxu0 %v2338_v0 }
  0x29   :  { %1959 = vmatpush3.bf16.msra.mxu1 %v2212_v15  ;;  %v2243_v15 = vld [vmem:[%s2733_s3 + $0x88] sm:$0xff]  }
  0x2a   :  { %1960 = vmatprep.subr.bf16.mxu1 %v2338_v0  ;;  %1941 = vmatpush3.bf16.msra.mxu0 %v2213_v16  ;;  %v2245_v16 = vld [vmem:[%s2733_s3 + $0x90] sm:$0xff]  }
  0x2b   :  { %1942 = vmatprep.subr.bf16.mxu0 %v2338_v0 }
  0x2d   :  { %1961 = vmatpush3.bf16.msra.mxu1 %v2214_v17  ;;  %v2247_v17 = vld [vmem:[%s2733_s3 + $0x98] sm:$0xff]  }
  0x2e   :  { %1962 = vmatprep.subr.bf16.mxu1 %v2338_v0  ;;  %1943 = vmatpush3.bf16.msra.mxu0 %v2215_v18  ;;  %v2249_v18 = vld [vmem:[%s2733_s3 + $0xa0] sm:$0xff]  }
  0x2f   :  { %1944 = vmatprep.subr.bf16.mxu0 %v2338_v0 }
  0x31   :  { %1963 = vmatpush3.bf16.msra.mxu1 %v2216_v19  ;;  %v2251_v19 = vld [vmem:[%s2733_s3 + $0xa8] sm:$0xff]  }
  0x32   :  { %1964 = vmatprep.subr.bf16.mxu1 %v2338_v0  ;;  %1945 = vmatpush3.bf16.msra.mxu0 %v2217_v20  ;;  %v1711_v20 = vld [vmem:[%s2735_s5 + $0x1] ss:$0 sm:$0xff] }
  0x33   :  { %1946 = vmatprep.subr.bf16.mxu0 %v2338_v0 }
  0x35   :  { %1965 = vmatpush3.bf16.msra.mxu1 %v2218_v21 }
  0x36   :  { %1966 = vmatprep.subr.bf16.mxu1 %v2338_v0  ;;  %1947 = vmatpush3.bf16.msra.mxu0 %v2219_v22 }
  0x37   :  { %1972 = vmatprep.subr.bf16.mxu0 %v2338_v0 }
  0x39   :  { %1967 = vmatpush3.bf16.msra.mxu1 %v2220_v23 }
  0x3a   :  { %1980 = vmatprep.subr.bf16.mxu1 %v2338_v0 }
  0xeb   :  { %v102_v24 = vpop.f32.mrb[0].mxu0 }
  0xec   :  { %v1922_v25 = vpop.f32.mrb[1].mxu0 }
  0xed   :  { %v105_v26 = vpop.f32.mrb[2].mxu0 }
  0xee   :  { %v1923_v27 = vpop.f32.mrb[3].mxu0 }
  0xef   :  { %v158_v29 = vpop.f32.mrb[0].mxu1 }
  0xf0   :  { %v159_v30 = vadd.f32 %v158_v29, %v102_v24  ;;  %v1930_v31 = vpop.f32.mrb[1].mxu1 }
  0xf1   :  { %v161_v32 = vpop.f32.mrb[2].mxu1  ;;  %v2242_v31 = vld [vmem:[#allocation2 + $0xc8] sm:$0xff]  }
  0xf2   :  { %v168_v33 = vadd.f32 %v1681_v28, %v159_v30  ;;  %v1931_v34 = vpop.f32.mrb[3].mxu1 }
  0xf3   :  { %v2246_v34 = vld [vmem:[#allocation2 + $0xd8] sm:$0xff]  }
  0xf4   :  { %v169_v35 = vmax.f32 %v168_v33, 0.0  ;;  %v2244_v33 = vld [vmem:[#allocation2 + $0xd0] sm:$0xff]  }
  0xf6   :  { %v2451_v37 = vpack.c.bf16 %v169_v35, %v169_v35  ;;  %v2248_v35 = vld [vmem:[#allocation2 + $0xe0] sm:$0xff]  }
  0xf8   :  { %1949 = vmatmul.mubr.bf16.vlgmr.msra.gmra.mrb[4].mxu0 %v2451_v37  ;;  %1969 = vmatmul.mubr.bf16.vlgmr.msra.gmra.mrb[4].mxu1 %v2451_v37 }
  0xf9   :  { %1973 = vmatpush3.bf16.msra.mxu0 %v2221_v36  ;;  %1976 = vmatprep.mubr.msk.bf16.mxu0 %vm2339_vm0, %v2338_v0  ;;  %v2250_v36 = vld [vmem:[#allocation2 + $0xe8] sm:$0xff]  }
  0xfa   :  { %1974 = vmatprep.subr.bf16.mxu0 %v2338_v0  ;;  %1996 = vmatprep.mubr.msk.bf16.mxu1 %vm2339_vm0, %v2338_v0 }
  0xfb   :  { %1981 = vmatpush3.bf16.msra.mxu1 %v2223_v39  ;;  %v2253_v39 = vld [vmem:[%s2733_s3 + $0xb0] sm:$0xff]  }
  0xfc   :  { %1982 = vmatprep.subr.bf16.mxu1 %v2338_v0 }
  0xfd   :  { %1975 = vmatpush3.bf16.msra.mxu0 %v2222_v38  ;;  %v2252_v38 = vld [vmem:[#allocation2 + $0xf0] sm:$0xff]  }
  0xfe   :  { %2000 = vmatprep.subr.bf16.mxu0 %v2338_v0 }
  0xff   :  { %1983 = vmatpush3.bf16.msra.mxu1 %v2225_v40  ;;  %v2254_v40 = vld [vmem:[#allocation2 + $0xf8] sm:$0xff]  }
 0x100   :  { %1984 = vmatprep.subr.bf16.mxu1 %v2338_v0 }
 0x103   :  { %1985 = vmatpush3.bf16.msra.mxu1 %v2227_v41  ;;  %v2255_v41 = vld [vmem:[%s2733_s3 + $0xb8] sm:$0xff]  }
 0x104   :  { %1986 = vmatprep.subr.bf16.mxu1 %v2338_v0 }
 0x107   :  { %1987 = vmatpush3.bf16.msra.mxu1 %v2229_v42  ;;  %v2256_v42 = vld [vmem:[#allocation2 + $0x100] sm:$0xff]  }
 0x108   :  { %1988 = vmatprep.subr.bf16.mxu1 %v2338_v0 }
 0x10b   :  { %1989 = vmatpush3.bf16.msra.mxu1 %v2231_v43  ;;  %v1723_v43 = vld [vmem:[%s2734_s4 + $0x2] ss:$0 sm:$0xff] }
 0x10c   :  { %1990 = vmatprep.subr.bf16.mxu1 %v2338_v0 }
 0x10f   :  { %1991 = vmatpush3.bf16.msra.mxu1 %v2233_v44 }
 0x110   :  { %1992 = vmatprep.subr.bf16.mxu1 %v2338_v0 }
 0x113   :  { %1993 = vmatpush3.bf16.msra.mxu1 %v2235_v62 }
 0x114   :  { %1994 = vmatprep.subr.bf16.mxu1 %v2338_v0 }
 0x117   :  { %1995 = vmatpush3.bf16.msra.mxu1 %v2237_v1 }
 0x118   :  { %2020 = vmatprep.subr.bf16.mxu1 %v2338_v0 }
 0x1cb   :  { %v273_v46 = vpop.f32.mrb[4].mxu0  ;;  %v382_v47 = vpop.f32.mrb[4].mxu1 }
 0x1cc   :  { %v2488_v48 = vadd.f32 %v1682_v45, %v273_v46  ;;  %v1950_v49 = vpop.f32.mrb[5].mxu0  ;;  %v1970_v50 = vpop.f32.mrb[5].mxu1 }
 0x1cd   :  { %v276_v51 = vpop.f32.mrb[6].mxu0  ;;  %v385_v52 = vpop.f32.mrb[6].mxu1 }
 0x1ce   :  { %v283_v54 = vpack.c.bf16 %v2488_v48, %v2488_v48  ;;  %v1951_v55 = vpop.f32.mrb[7].mxu0  ;;  %v1971_v56 = vpop.f32.mrb[7].mxu1  ;;  %v2257_v51 = vld [vmem:[#allocation2 + $0xb8] sm:$0xff]  }
 0x1cf   :  { %v2276_v55 = vld [vmem:[%s2733_s3 + $0xc8] sm:$0xff]   ;;  %v2277_v56 = vld [vmem:[%s2733_s3 + $0xd0] sm:$0xff]  }
 0x1d0   :  { %1977 = vmatmul.mubr.msk.bf16.vlgmr.msra.gmra.mrb[8].mxu0 %vm120_vm2, %v283_v54  ;;  %v2275_v54 = vld [vmem:[%s2733_s3 + $0xc0] sm:$0xff]  }
 0x1d1   :  { %2001 = vmatpush3.bf16.msra.mxu0 %v2224_v53  ;;  %2016 = vmatprep.mubr.msk.bf16.mxu0 %vm2339_vm0, %v2338_v0  ;;  %v2258_v53 = vld [vmem:[#allocation2 + $0xc0] sm:$0xff]  }
 0x1d2   :  { %2002 = vmatprep.subr.bf16.mxu0 %v2338_v0 }
 0x1d5   :  { %2003 = vmatpush3.bf16.msra.mxu0 %v2226_v57  ;;  %v2278_v57 = vld [vmem:[%s2733_s3 + $0xd8] sm:$0xff]  }
 0x1d6   :  { %2004 = vmatprep.subr.bf16.mxu0 %v2338_v0 }
 0x1d9   :  { %2005 = vmatpush3.bf16.msra.mxu0 %v2228_v58  ;;  %v2279_v58 = vld [vmem:[%s2733_s3 + $0xe0] sm:$0xff]  }
 0x1da   :  { %2006 = vmatprep.subr.bf16.mxu0 %v2338_v0 }
 0x1dd   :  { %2007 = vmatpush3.bf16.msra.mxu0 %v2230_v59  ;;  %v2280_v59 = vld [vmem:[%s2733_s3 + $0xe8] sm:$0xff]  }
 0x1de   :  { %2008 = vmatprep.subr.bf16.mxu0 %v2338_v0 }
 0x1e1   :  { %2009 = vmatpush3.bf16.msra.mxu0 %v2232_v60  ;;  %v1732_v60 = vld [vmem:[%s2735_s5 + $0x2] ss:$0 sm:$0xff] }
 0x1e2   :  { %2010 = vmatprep.subr.bf16.mxu0 %v2338_v0 }
 0x1e5   :  { %2011 = vmatpush3.bf16.msra.mxu0 %v2234_v61 }
 0x1e6   :  { %2012 = vmatprep.subr.bf16.mxu0 %v2338_v0 }
 0x1e9   :  { %2013 = vmatpush3.bf16.msra.mxu0 %v2236_v63 }
 0x1ea   :  { %2014 = vmatprep.subr.bf16.mxu0 %v2338_v0 }
 0x1ed   :  { %2015 = vmatpush3.bf16.msra.mxu0 %v2238_v2 }
 0x1ee   :  { %2028 = vmatprep.subr.bf16.mxu0 %v2338_v0 }
 0x2a3   :  { %v437_v4 = vpop.f32.mrb[8].mxu0 }
 0x2a4   :  { %v438_v5 = vadd.f32 %v437_v4, %v382_v47  ;;  %v1978_v6 = vpop.f32.mrb[9].mxu0 }
 0x2a5   :  { %v440_v7 = vpop.f32.mrb[10].mxu0 }
 0x2a6   :  { %v447_v8 = vadd.f32 %v1702_v3, %v438_v5  ;;  %v1979_v9 = vpop.f32.mrb[11].mxu0 }
 0x2a8   :  { %v448_v10 = vmax.f32 %v447_v8, 0.0  ;;  %v2259_v8 = vld [vmem:[#allocation2 + $0x148] sm:$0xff]  }
 0x2aa   :  { %v2514_v12 = vpack.c.bf16 %v448_v10, %v448_v10  ;;  %v2260_v10 = vld [vmem:[#allocation2 + $0x150] sm:$0xff]  }
 0x2ac   :  { %1997 = vmatmul.mubr.bf16.vlgmr.msra.gmra.mrb[8].mxu1 %v2514_v12  ;;  %2017 = vmatmul.mubr.bf16.vlgmr.msra.gmra.mrb[12].mxu0 %v2514_v12 }
 0x2ad   :  { %2021 = vmatpush3.bf16.msra.mxu1 %v2239_v11  ;;  %2024 = vmatprep.mubr.msk.bf16.mxu1 %vm2339_vm0, %v2338_v0  ;;  %v2261_v11 = vld [vmem:[#allocation2 + $0x158] sm:$0xff]  }
 0x2ae   :  { %2022 = vmatprep.subr.bf16.mxu1 %v2338_v0  ;;  %2044 = vmatprep.mubr.msk.bf16.mxu0 %vm2339_vm0, %v2338_v0 }
 0x2af   :  { %2029 = vmatpush3.bf16.msra.mxu0 %v2241_v14  ;;  %v2263_v14 = vld [vmem:[#allocation2 + $0x168] sm:$0xff]  }
 0x2b0   :  { %2030 = vmatprep.subr.bf16.mxu0 %v2338_v0 }
 0x2b1   :  { %2023 = vmatpush3.bf16.msra.mxu1 %v2240_v13  ;;  %v2262_v13 = vld [vmem:[#allocation2 + $0x160] sm:$0xff]  }
 0x2b2   :  { %2048 = vmatprep.subr.bf16.mxu1 %v2338_v0 }
 0x2b3   :  { %2031 = vmatpush3.bf16.msra.mxu0 %v2243_v15  ;;  %v2264_v15 = vld [vmem:[#allocation2 + $0x170] sm:$0xff]  }
 0x2b4   :  { %2032 = vmatprep.subr.bf16.mxu0 %v2338_v0 }
 0x2b7   :  { %2033 = vmatpush3.bf16.msra.mxu0 %v2245_v16  ;;  %v2265_v16 = vld [vmem:[#allocation2 + $0x178] sm:$0xff]  }
 0x2b8   :  { %2034 = vmatprep.subr.bf16.mxu0 %v2338_v0 }
 0x2bb   :  { %2035 = vmatpush3.bf16.msra.mxu0 %v2247_v17  ;;  %v2266_v17 = vld [vmem:[#allocation2 + $0x180] sm:$0xff]  }
 0x2bc   :  { %2036 = vmatprep.subr.bf16.mxu0 %v2338_v0 }
 0x2bf   :  { %2037 = vmatpush3.bf16.msra.mxu0 %v2249_v18  ;;  %v2267_v18 = vld [vmem:[#allocation2 + $0x188] sm:$0xff]  }
 0x2c0   :  { %2038 = vmatprep.subr.bf16.mxu0 %v2338_v0 }
 0x2c3   :  { %2039 = vmatpush3.bf16.msra.mxu0 %v2251_v19  ;;  %v2268_v19 = vld [vmem:[#allocation2 + $0x190] sm:$0xff]  }
 0x2c4   :  { %2040 = vmatprep.subr.bf16.mxu0 %v2338_v0 }
 0x2c7   :  { %2041 = vmatpush3.bf16.msra.mxu0 %v2253_v39  ;;  %v2285_v39 = vld [vmem:[#allocation2 + $0x118] sm:$0xff]  }
 0x2c8   :  { %2042 = vmatprep.subr.bf16.mxu0 %v2338_v0 }
 0x2cb   :  { %2043 = vmatpush3.bf16.msra.mxu0 %v2255_v41  ;;  %v2287_v41 = vld [vmem:[#allocation2 + $0x128] sm:$0xff]  }
 0x2cc   :  { %2068 = vmatprep.subr.bf16.mxu0 %v2338_v0 }
 0x37f   :  { %v548_v21 = vpop.f32.mrb[8].mxu1  ;;  %v663_v22 = vpop.f32.mrb[12].mxu0 }
 0x380   :  { %v554_v23 = vadd.f32 %v548_v21, %v2488_v48  ;;  %v1998_v24 = vpop.f32.mrb[9].mxu1  ;;  %v2018_v25 = vpop.f32.mrb[13].mxu0  ;;  %v2270_v21 = vld [vmem:[#allocation2 + $0x1a0] sm:$0xff]  }
 0x381   :  { %v551_v26 = vpop.f32.mrb[10].mxu1  ;;  %v666_v27 = vpop.f32.mrb[14].mxu0  ;;  %v2274_v24 = vld [vmem:[#allocation2 + $0x1c0] sm:$0xff]   ;;  %v2281_v25 = vld [vmem:[%s2733_s3 + $0xf0] sm:$0xff]  }
 0x382   :  { %v2552_v28 = vadd.f32 %v1711_v20, %v554_v23  ;;  %v1999_v29 = vpop.f32.mrb[11].mxu1  ;;  %v2019_v30 = vpop.f32.mrb[15].mxu0  ;;  %v2269_v20 = vld [vmem:[#allocation2 + $0x198] sm:$0xff]   ;;  %v1744_v27 = vld [vmem:[%s2734_s4 + $0x3] ss:$0 sm:$0xff] }
 0x383   :  { %v2273_v23 = vld [vmem:[#allocation2 + $0x1b8] sm:$0xff]  }
 0x384   :  { %v564_v32 = vpack.c.bf16 %v2552_v28, %v2552_v28  ;;  %v2282_v26 = vld [vmem:[%s2733_s3 + $0xf8] sm:$0xff]  }
 0x386   :  { %2025 = vmatmul.mubr.msk.bf16.vlgmr.msra.gmra.mrb[12].mxu1 %vm120_vm2, %v564_v32 }
 0x387   :  { %2049 = vmatpush3.bf16.msra.mxu1 %v2242_v31  ;;  %2064 = vmatprep.mubr.msk.bf16.mxu1 %vm2339_vm0, %v2338_v0 }
 0x388   :  { %2050 = vmatprep.subr.bf16.mxu1 %v2338_v0 }
 0x38b   :  { %2051 = vmatpush3.bf16.msra.mxu1 %v2244_v33 }
 0x38c   :  { %2052 = vmatprep.subr.bf16.mxu1 %v2338_v0 }
 0x38f   :  { %2053 = vmatpush3.bf16.msra.mxu1 %v2246_v34 }
 0x390   :  { %2054 = vmatprep.subr.bf16.mxu1 %v2338_v0 }
 0x393   :  { %2055 = vmatpush3.bf16.msra.mxu1 %v2248_v35  ;;  %v2283_v35 = vld [vmem:[#allocation2 + $0x108] sm:$0xff]  }
 0x394   :  { %2056 = vmatprep.subr.bf16.mxu1 %v2338_v0 }
 0x397   :  { %2057 = vmatpush3.bf16.msra.mxu1 %v2250_v36 }
 0x398   :  { %2058 = vmatprep.subr.bf16.mxu1 %v2338_v0 }
 0x39b   :  { %2059 = vmatpush3.bf16.msra.mxu1 %v2252_v38  ;;  %v2284_v38 = vld [vmem:[#allocation2 + $0x110] sm:$0xff]  }
 0x39c   :  { %2060 = vmatprep.subr.bf16.mxu1 %v2338_v0 }
 0x39f   :  { %2061 = vmatpush3.bf16.msra.mxu1 %v2254_v40  ;;  %v2286_v40 = vld [vmem:[#allocation2 + $0x120] sm:$0xff]  }
 0x3a0   :  { %2062 = vmatprep.subr.bf16.mxu1 %v2338_v0 }
 0x3a3   :  { %2063 = vmatpush3.bf16.msra.mxu1 %v2256_v42  ;;  %v2288_v42 = vld [vmem:[#allocation2 + $0x130] sm:$0xff]  }
 0x3a4   :  { %2076 = vmatprep.subr.bf16.mxu1 %v2338_v0 }
 0x459   :  { %v718_v44 = vpop.f32.mrb[12].mxu1 }
 0x45a   :  { %v719_v45 = vadd.f32 %v718_v44, %v663_v22  ;;  %v2026_v46 = vpop.f32.mrb[13].mxu1  ;;  %v2271_v22 = vld [vmem:[#allocation2 + $0x1a8] sm:$0xff]  }
 0x45b   :  { %v721_v47 = vpop.f32.mrb[14].mxu1 }
 0x45c   :  { %v728_v48 = vadd.f32 %v1723_v43, %v719_v45  ;;  %v2027_v49 = vpop.f32.mrb[15].mxu1  ;;  %v2289_v43 = vld [vmem:[#allocation2 + $0x138] sm:$0xff]   ;;  %v2290_v47 = vld [vmem:[#allocation2 + $0x140] sm:$0xff]  }
 0x45d   :  { %v2291_v49 = vld [vmem:[#allocation2 + $0x1c8] sm:$0xff]  }
 0x45e   :  { %v729_v50 = vmax.f32 %v728_v48, 0.0 }
 0x460   :  { %v2578_v52 = vpack.c.bf16 %v729_v50, %v729_v50  ;;  %v2292_v50 = vld [vmem:[#allocation2 + $0x1d0] sm:$0xff]  }
 0x462   :  { %2045 = vmatmul.mubr.bf16.vlgmr.msra.gmra.mrb[16].mxu0 %v2578_v52  ;;  %2065 = vmatmul.mubr.bf16.vlgmr.msra.gmra.mrb[16].mxu1 %v2578_v52 }
 0x463   :  { %2069 = vmatpush3.bf16.msra.mxu0 %v2257_v51  ;;  %2072 = vmatprep.mubr.msk.bf16.mxu0 %vm2339_vm0, %v2338_v0  ;;  %v2293_v51 = vld [vmem:[#allocation2 + $0x1d8] sm:$0xff]  }
 0x464   :  { %2070 = vmatprep.subr.bf16.mxu0 %v2338_v0  ;;  %2092 = vmatprep.mubr.msk.bf16.mxu1 %vm2339_vm0, %v2338_v0 }
 0x465   :  { %2077 = vmatpush3.bf16.msra.mxu1 %v2275_v54  ;;  %v2297_v54 = vld [vmem:[#allocation2 + $0x1f8] sm:$0xff]  }
 0x466   :  { %2078 = vmatprep.subr.bf16.mxu1 %v2338_v0 }
 0x467   :  { %2071 = vmatpush3.bf16.msra.mxu0 %v2258_v53  ;;  %v2295_v53 = vld [vmem:[#allocation2 + $0x1e8] sm:$0xff]  }
 0x468   :  { %2096 = vmatprep.subr.bf16.mxu0 %v2338_v0 }
 0x469   :  { %2079 = vmatpush3.bf16.msra.mxu1 %v2276_v55 }
 0x46a   :  { %2080 = vmatprep.subr.bf16.mxu1 %v2338_v0 }
 0x46d   :  { %2081 = vmatpush3.bf16.msra.mxu1 %v2277_v56 }
 0x46e   :  { %2082 = vmatprep.subr.bf16.mxu1 %v2338_v0 }
 0x471   :  { %2083 = vmatpush3.bf16.msra.mxu1 %v2278_v57 }
 0x472   :  { %2084 = vmatprep.subr.bf16.mxu1 %v2338_v0 }
 0x475   :  { %2085 = vmatpush3.bf16.msra.mxu1 %v2279_v58  ;;  %v2298_v58 = vld [vmem:[#allocation2 + $0x200] sm:$0xff]  }
 0x476   :  { %2086 = vmatprep.subr.bf16.mxu1 %v2338_v0 }
 0x479   :  { %2087 = vmatpush3.bf16.msra.mxu1 %v2280_v59 }
 0x47a   :  { %2088 = vmatprep.subr.bf16.mxu1 %v2338_v0 }
 0x47d   :  { %2089 = vmatpush3.bf16.msra.mxu1 %v2281_v25 }
 0x47e   :  { %2090 = vmatprep.subr.bf16.mxu1 %v2338_v0 }
 0x481   :  { %2091 = vmatpush3.bf16.msra.mxu1 %v2282_v26  ;;  %v1787_v26 = vld [vmem:[%s2735_s5 + $0x4] ss:$0 sm:$0xff] }
 0x482   :  { %2116 = vmatprep.subr.bf16.mxu1 %v2338_v0 }
 0x535   :  { %v829_v61 = vpop.f32.mrb[16].mxu0  ;;  %v2615_v62 = vpop.f32.mrb[16].mxu1 }
 0x536   :  { %v835_v63 = vadd.f32 %v829_v61, %v2552_v28  ;;  %v2046_v1 = vpop.f32.mrb[17].mxu0  ;;  %v2066_v2 = vpop.f32.mrb[17].mxu1  ;;  %v2300_v61 = vld [vmem:[%s2733_s3 + $0x108] sm:$0xff]  }
 0x537   :  { %v832_v3 = vpop.f32.mrb[18].mxu0  ;;  %v947_v4 = vpop.f32.mrb[18].mxu1  ;;  %v2303_v1 = vld [vmem:[%s2733_s3 + $0x120] sm:$0xff]   ;;  %v2304_v2 = vld [vmem:[%s2733_s3 + $0x128] sm:$0xff]  }
 0x538   :  { %v2618_v5 = vadd.f32 %v1732_v60, %v835_v63  ;;  %v2047_v6 = vpop.f32.mrb[19].mxu0  ;;  %v2067_v7 = vpop.f32.mrb[19].mxu1  ;;  %v2299_v60 = vld [vmem:[%s2733_s3 + $0x100] sm:$0xff]   ;;  %v2302_v63 = vld [vmem:[%s2733_s3 + $0x118] sm:$0xff]   ;;  %v2305_v3 = vld [vmem:[%s2733_s3 + $0x130] sm:$0xff]  }
 0x539   :  { %v2306_v4 = vld [vmem:[%s2733_s3 + $0x138] sm:$0xff]   ;;  %v1753_v6 = vld [vmem:[%s2735_s5 + $0x3] ss:$0 sm:$0xff] }
 0x53a   :  { %v845_v9 = vpack.c.bf16 %v2618_v5, %v2618_v5 }
 0x53c   :  { %2073 = vmatmul.mubr.msk.bf16.vlgmr.msra.gmra.mrb[20].mxu0 %vm120_vm2, %v845_v9 }
 0x53d   :  { %2097 = vmatpush3.bf16.msra.mxu0 %v2259_v8  ;;  %2112 = vmatprep.mubr.msk.bf16.mxu0 %vm2339_vm0, %v2338_v0 }
 0x53e   :  { %2098 = vmatprep.subr.bf16.mxu0 %v2338_v0 }
 0x541   :  { %2099 = vmatpush3.bf16.msra.mxu0 %v2260_v10 }
 0x542   :  { %2100 = vmatprep.subr.bf16.mxu0 %v2338_v0 }
 0x545   :  { %2101 = vmatpush3.bf16.msra.mxu0 %v2261_v11 }
 0x546   :  { %2102 = vmatprep.subr.bf16.mxu0 %v2338_v0 }
 0x549   :  { %2103 = vmatpush3.bf16.msra.mxu0 %v2262_v13 }
 0x54a   :  { %2104 = vmatprep.subr.bf16.mxu0 %v2338_v0 }
 0x54d   :  { %2105 = vmatpush3.bf16.msra.mxu0 %v2263_v14 }
 0x54e   :  { %2106 = vmatprep.subr.bf16.mxu0 %v2338_v0 }
 0x551   :  { %2107 = vmatpush3.bf16.msra.mxu0 %v2264_v15 }
 0x552   :  { %2108 = vmatprep.subr.bf16.mxu0 %v2338_v0 }
 0x555   :  { %2109 = vmatpush3.bf16.msra.mxu0 %v2265_v16 }
 0x556   :  { %2110 = vmatprep.subr.bf16.mxu0 %v2338_v0 }
 0x559   :  { %2111 = vmatpush3.bf16.msra.mxu0 %v2266_v17 }
 0x55a   :  { %2136 = vmatprep.subr.bf16.mxu0 %v2338_v0 }
 0x55c   :  { %2113 = vmatmul.mubr.bf16.vlgmr.msra.gmra.mrb[24].mxu0 %v2514_v12  ;;  %v2272_v12 = vld [vmem:[#allocation2 + $0x1b0] sm:$0xff]  }
 0x55d   :  { %2137 = vmatpush3.bf16.msra.mxu0 %v2267_v18  ;;  %2152 = vmatprep.mubr.msk.bf16.mxu0 %vm2339_vm0, %v2338_v0 }
 0x55e   :  { %2138 = vmatprep.subr.bf16.mxu0 %v2338_v0 }
 0x561   :  { %2139 = vmatpush3.bf16.msra.mxu0 %v2268_v19 }
 0x562   :  { %2140 = vmatprep.subr.bf16.mxu0 %v2338_v0 }
 0x565   :  { %2141 = vmatpush3.bf16.msra.mxu0 %v2269_v20 }
 0x566   :  { %2142 = vmatprep.subr.bf16.mxu0 %v2338_v0 }
 0x569   :  { %2143 = vmatpush3.bf16.msra.mxu0 %v2270_v21 }
 0x56a   :  { %2144 = vmatprep.subr.bf16.mxu0 %v2338_v0 }
 0x56d   :  { %2145 = vmatpush3.bf16.msra.mxu0 %v2271_v22 }
 0x56e   :  { %2146 = vmatprep.subr.bf16.mxu0 %v2338_v0 }
 0x571   :  { %2147 = vmatpush3.bf16.msra.mxu0 %v2272_v12 }
 0x572   :  { %2148 = vmatprep.subr.bf16.mxu0 %v2338_v0 }
 0x575   :  { %2149 = vmatpush3.bf16.msra.mxu0 %v2273_v23 }
 0x576   :  { %2150 = vmatprep.subr.bf16.mxu0 %v2338_v0 }
 0x579   :  { %2151 = vmatpush3.bf16.msra.mxu0 %v2274_v24 }
 0x57a   :  { %2176 = vmatprep.subr.bf16.mxu0 %v2338_v0 }
 0x57c   :  { %2153 = vmatmul.mubr.bf16.vlgmr.msra.gmra.mrb[28].mxu0 %v2578_v52  ;;  %v2294_v52 = vld [vmem:[#allocation2 + $0x1e0] sm:$0xff]  }
 0x57d   :  { %2192 = vmatprep.mubr.msk.bf16.mxu0 %vm2339_vm0, %v2338_v0  ;;  %2177 = vmatpush3.bf16.msra.mxu0 %v2299_v60 }
 0x57e   :  { %2178 = vmatprep.subr.bf16.mxu0 %v2338_v0 }
 0x581   :  { %2179 = vmatpush3.bf16.msra.mxu0 %v2300_v61 }
 0x582   :  { %2180 = vmatprep.subr.bf16.mxu0 %v2338_v0 }
 0x60f   :  { %v999_v28 = vpop.f32.mrb[20].mxu0 }
 0x610   :  { %v1000_v29 = vadd.f32 %v999_v28, %v2615_v62  ;;  %v2074_v30 = vpop.f32.mrb[21].mxu0  ;;  %v2301_v62 = vld [vmem:[%s2733_s3 + $0x110] sm:$0xff]  }
 0x611   :  { %v1002_v31 = vpop.f32.mrb[22].mxu0  ;;  %2181 = vmatpush3.bf16.msra.mxu0 %v2301_v62 }
 0x612   :  { %v1009_v32 = vadd.f32 %v1744_v27, %v1000_v29  ;;  %v2075_v33 = vpop.f32.mrb[23].mxu0  ;;  %2182 = vmatprep.subr.bf16.mxu0 %v2338_v0 }
 0x614   :  { %v1010_v34 = vmax.f32 %v1009_v32, 0.0 }
 0x615   :  { %2183 = vmatpush3.bf16.msra.mxu0 %v2302_v63 }
 0x616   :  { %v1011_v36 = vpack.c.bf16 %v1010_v34, %v1010_v34  ;;  %2184 = vmatprep.subr.bf16.mxu0 %v2338_v0 }
 0x618   :  { %2093 = vmatmul.mubr.bf16.vlgmr.msra.gmra.mrb[20].mxu1 %v1011_v36 }
 0x619   :  { %2117 = vmatpush3.bf16.msra.mxu1 %v2283_v35  ;;  %2132 = vmatprep.mubr.msk.bf16.mxu1 %vm2339_vm0, %v2338_v0 }
 0x61a   :  { %2118 = vmatprep.subr.bf16.mxu1 %v2338_v0  ;;  %2185 = vmatpush3.bf16.msra.mxu0 %v2303_v1 }
 0x61b   :  { %2186 = vmatprep.subr.bf16.mxu0 %v2338_v0 }
 0x61d   :  { %2119 = vmatpush3.bf16.msra.mxu1 %v2284_v38 }
 0x61e   :  { %2120 = vmatprep.subr.bf16.mxu1 %v2338_v0  ;;  %2187 = vmatpush3.bf16.msra.mxu0 %v2304_v2 }
 0x61f   :  { %2188 = vmatprep.subr.bf16.mxu0 %v2338_v0 }
 0x621   :  { %2121 = vmatpush3.bf16.msra.mxu1 %v2285_v39 }
 0x622   :  { %2122 = vmatprep.subr.bf16.mxu1 %v2338_v0  ;;  %2189 = vmatpush3.bf16.msra.mxu0 %v2305_v3 }
 0x623   :  { %2190 = vmatprep.subr.bf16.mxu0 %v2338_v0 }
 0x625   :  { %2123 = vmatpush3.bf16.msra.mxu1 %v2286_v40 }
 0x626   :  { %2124 = vmatprep.subr.bf16.mxu1 %v2338_v0  ;;  %2191 = vmatpush3.bf16.msra.mxu0 %v2306_v4 }
 0x629   :  { %2125 = vmatpush3.bf16.msra.mxu1 %v2287_v41 }
 0x62a   :  { %2126 = vmatprep.subr.bf16.mxu1 %v2338_v0 }
 0x62d   :  { %2127 = vmatpush3.bf16.msra.mxu1 %v2288_v42 }
 0x62e   :  { %2128 = vmatprep.subr.bf16.mxu1 %v2338_v0 }
 0x62f   :  { %v2667_v44 = vpop.f32.mrb[24].mxu0 }
 0x630   :  { %v2114_v45 = vpop.f32.mrb[25].mxu0 }
 0x631   :  { %v1239_v46 = vpop.f32.mrb[26].mxu0  ;;  %2129 = vmatpush3.bf16.msra.mxu1 %v2289_v43 }
 0x632   :  { %v2115_v48 = vpop.f32.mrb[27].mxu0  ;;  %2130 = vmatprep.subr.bf16.mxu1 %v2338_v0 }
 0x635   :  { %2131 = vmatpush3.bf16.msra.mxu1 %v2290_v47 }
 0x636   :  { %2156 = vmatprep.subr.bf16.mxu1 %v2338_v0 }
 0x638   :  { %2133 = vmatmul.mubr.bf16.vlgmr.msra.gmra.mrb[24].mxu1 %v2451_v37  ;;  %v2296_v37 = vld [vmem:[#allocation2 + $0x1f0] sm:$0xff]  }
 0x639   :  { %2157 = vmatpush3.bf16.msra.mxu1 %v2291_v49  ;;  %2172 = vmatprep.mubr.msk.bf16.mxu1 %vm2339_vm0, %v2338_v0 }
 0x63a   :  { %2158 = vmatprep.subr.bf16.mxu1 %v2338_v0 }
 0x63d   :  { %2159 = vmatpush3.bf16.msra.mxu1 %v2292_v50 }
 0x63e   :  { %2160 = vmatprep.subr.bf16.mxu1 %v2338_v0 }
 0x641   :  { %2161 = vmatpush3.bf16.msra.mxu1 %v2293_v51 }
 0x642   :  { %2162 = vmatprep.subr.bf16.mxu1 %v2338_v0 }
 0x645   :  { %2163 = vmatpush3.bf16.msra.mxu1 %v2294_v52 }
 0x646   :  { %2164 = vmatprep.subr.bf16.mxu1 %v2338_v0 }
 0x649   :  { %2165 = vmatpush3.bf16.msra.mxu1 %v2295_v53 }
 0x64a   :  { %2166 = vmatprep.subr.bf16.mxu1 %v2338_v0 }
 0x64d   :  { %2167 = vmatpush3.bf16.msra.mxu1 %v2296_v37 }
 0x64e   :  { %2168 = vmatprep.subr.bf16.mxu1 %v2338_v0 }
 0x64f   :  { %v1428_v55 = vpop.f32.mrb[28].mxu0 }
 0x650   :  { %v2154_v56 = vpop.f32.mrb[29].mxu0 }
 0x651   :  { %v1431_v57 = vpop.f32.mrb[30].mxu0  ;;  %2169 = vmatpush3.bf16.msra.mxu1 %v2297_v54 }
 0x652   :  { %v2155_v59 = vpop.f32.mrb[31].mxu0  ;;  %2170 = vmatprep.subr.bf16.mxu1 %v2338_v0 }
 0x655   :  { %2171 = vmatpush3.bf16.msra.mxu1 %v2298_v58 }
 0x658   :  { %2173 = vmatmul.mubr.bf16.vlgmr.msra.gmra.mrb[28].mxu1 %v1011_v36 }
 0x6eb   :  { %v1110_v7 = vpop.f32.mrb[20].mxu1 }
 0x6ec   :  { %v1116_v8 = vadd.f32 %v1110_v7, %v2618_v5  ;;  %v2094_v9 = vpop.f32.mrb[21].mxu1  ;;  %v1786_v5 = vld [vmem:[%s2734_s4 + $0x4] ss:$0 sm:$0xff]  ;;  %s2340_s4 = smov 32  }
 0x6ed   :  { %v1113_v10 = vpop.f32.mrb[22].mxu1 }
 0x6ee   :  { %v1121_v11 = vadd.f32 %v1753_v6, %v1116_v8  ;;  %v2095_v13 = vpop.f32.mrb[23].mxu1 }
 0x6f0   :  { %1664 = vst.msk [vmem:[%s2736_s6] sm:$0xff] %vm120_vm2, %v1121_v11 }
 0x70b   :  { %v1324_v0 = vpop.f32.mrb[24].mxu1 }
 0x70c   :  { %v1325_v14 = vadd.f32 %v1324_v0, %v2667_v44  ;;  %v2134_v15 = vpop.f32.mrb[25].mxu1 }
 0x70d   :  { %v1327_v16 = vpop.f32.mrb[26].mxu1 }
 0x70e   :  { %v2135_v17 = vpop.f32.mrb[27].mxu1  ;;  %v1434_v18 = vadd.f32 %v1428_v55, %v1325_v14 }
 0x72b   :  { %v1533_v19 = vpop.f32.mrb[28].mxu1 }
 0x72c   :  { %v1539_v20 = vadd.f32 %v1533_v19, %v1434_v18  ;;  %v2174_v21 = vpop.f32.mrb[29].mxu1 }
 0x72d   :  { %v1536_v22 = vpop.f32.mrb[30].mxu1 }
 0x72e   :  { %v1544_v12 = vadd.f32 %v1786_v5, %v1539_v20  ;;  %v2175_v23 = vpop.f32.mrb[31].mxu1 }
 0x730   :  { %v1545_v24 = vmax.f32 %v1544_v12, 0.0 }
 0x732   :  { %v1562_v25 = vpack.c.bf16 %v1545_v24, %v1545_v24 }
 0x734   :  { %2193 = vmatmul.mubr.bf16.vlgmr.msra.gmra.mrb[32].mxu0 %v1562_v25 }
 0x807   :  { %v1649_v27 = vpop.f32.mrb[32].mxu0 }
 0x808   :  { %v1650_v28 = vadd.f32 %v1787_v26, %v1649_v27  ;;  %v2194_v29 = vpop.f32.mrb[33].mxu0 }
 0x809   :  { %v1652_v30 = vpop.f32.mrb[34].mxu0 }
 0x80a   :  { %v1656_v31 = vand.u32 2147483647, %v1650_v28  ;;  %v2195_v32 = vpop.f32.mrb[35].mxu0  ;;  %v1655_v39 = vmax.f32 %v1650_v28, 0.0 }
 0x80c   :  { %v1657_v33 = vsub.f32 0.0, %v1656_v31 }
 0x80e   :  { %v1658_v34 = vmul.f32 1.442695, %v1657_v33 }
 0x810   :  { %2307 = vpow2.f32 %v1658_v34 }
 0x81a   :  { %v2308_v35 = vpop.eup %2307 }
 0x81b   :  { %v1660_v36 = vadd.f32 1.0, %v2308_v35 }
 0x81d   :  { %2309 = vlog2.f32 %v1660_v36 }
 0x827   :  { %v2310_v38 = vpop.eup %2309 }
 0x828   :  { %v1662_v40 = vmul.f32 0.6931472, %v2310_v38 }
 0x82a   :  { %v1663_v41 = vadd.f32 %v1662_v40, %v1655_v39 }
 0x82c   :  { %1666 = vrot.lane.b32.xlu0 %v1663_v41, %s2340_s4 }
 0x89e   :  { %v1667_v42 = vpop.permute.xlu0 %1666 }
 0x89f   :  { %1670 = vst.msk [vmem:[%s2736_s6] sm:$0xff] %vm1669_vm3, %v1667_v42 }
 0x8a0   :  { %1675 = vsyncpa [#allocation3], 1 }

</bundles_post_ra>
